<compile_context>
chip_gen: v6e
topology: v6e:2x2x1
jax: 0.10.0
libtpu: 0.0.40
codegen_flags: <defaults>
</compile_context>

<pallas_src>
from functools import partial

import numpy as np
import jax
import jax.numpy as jnp
from jax.experimental import pallas as pl
from jax.experimental.pallas import tpu as pltpu

EPS = 1e-5

_ROLL_FWD = None  # cached: True if pltpu.roll follows jnp.roll's shift direction


def _roll_is_forward():
    """One-time on-device probe of pltpu.roll's shift direction (cheap, cached)."""
    global _ROLL_FWD
    if _ROLL_FWD is None:
        def probe(x_ref, o_ref):
            o_ref[...] = pltpu.roll(x_ref[...], shift=1, axis=1)

        x = jnp.broadcast_to(jnp.arange(128, dtype=jnp.float32), (8, 128))
        y = pl.pallas_call(
            probe, out_shape=jax.ShapeDtypeStruct((8, 128), jnp.float32))(x)
        _ROLL_FWD = bool(y[0, 0] == 127.0)  # jnp.roll convention: out[0] == x[-1]
    return _ROLL_FWD


def _interp_matrix_np(n_in, n_out):
    """Linear-interp matrix (n_out, n_in), align_corners=True.  Shape-only -> numpy
    so it becomes a compile-time constant (hoisted out of the per-call hot path)."""
    out_idx = np.arange(n_out, dtype=np.float64)
    src = out_idx * (n_in - 1) / max(n_out - 1, 1)
    lo = np.clip(np.floor(src).astype(np.int64), 0, max(n_in - 2, 0))
    frac = (src - lo).astype(np.float32)
    m = np.zeros((n_out, n_in), np.float32)
    rows = np.arange(n_out)
    m[rows, lo] += 1.0 - frac
    m[rows, np.minimum(lo + 1, n_in - 1)] += frac
    return m


# --------------------------- the fused Pallas kernel ---------------------------
def _make_fused_kernel(wp, n_valid, roll_fwd):
    inv_cnt = 1.0 / float(n_valid)
    # 3x3 tap offsets expressed in the flattened, zero-ring-padded pixel coordinate
    shifts = [(dy - 1) * wp + (dx - 1) for dy in range(3) for dx in range(3)]

    def kernel(cat_ref, mask_ref, w1_ref, w23_ref, p1_ref, p2_ref, o_ref,
               st1_ref, st2_ref):
        lpg = cat_ref.shape[1]
        cin_p = cat_ref.shape[0]
        cmid_p = w1_ref.shape[0]

        def shifted(x, s):
            # x'[:, p] == x[:, p + s]; roll wrap-around only lands in guard lanes
            if s == 0:
                return x
            amt = (-s) % lpg if roll_fwd else s % lpg
            return pltpu.roll(x, shift=amt, axis=1)

        mask = mask_ref[...]                       # (1, Lpg), 1.0 on valid pixels
        p1 = p1_ref[...]                           # (Cmid_p, 4): [b1, g1, beta1, 0]
        p2 = p2_ref[...]                           # (Cout_p, 4): [b2+b3, g2, beta2, 0]
        cat32 = cat_ref[...].astype(jnp.float32)   # rolls on f32 (XLU-native)

        # ---- Conv3x3 #1: im2col-by-roll into a (9*Cin_p, Lpg) bf16 scratch,
        #      consumed by ONE K-stacked MXU matmul.
        for t, s in enumerate(shifts):
            st1_ref[t * cin_p:(t + 1) * cin_p, :] = (
                shifted(cat32, s).astype(jnp.bfloat16))
        acc1 = jnp.dot(w1_ref[...], st1_ref[...],
                       preferred_element_type=jnp.float32)          # (Cmid_p, Lpg)
        y = jnp.maximum(acc1 + p1[:, 0:1], 0.0)                     # + b1, ReLU

        # ---- BatchNorm1: training-mode batch stats over the N*Ho*Wo valid pixels
        mean1 = jnp.sum(y * mask, axis=1, keepdims=True) * inv_cnt
        var1 = jnp.sum(jnp.square(y - mean1) * mask, axis=1, keepdims=True) * inv_cnt
        h1 = ((y - mean1) * jax.lax.rsqrt(var1 + EPS) * p1[:, 1:2] + p1[:, 2:3]) * mask
        # "* mask" restores the zero padding ring that conv #2 relies on

        # ---- Conv3x3 #2 + 1x1 shortcut folded into ONE matmul:
        #      stacked2 = [9 shifted h1 tap blocks ; cat]
        for t, s in enumerate(shifts):
            st2_ref[t * cmid_p:(t + 1) * cmid_p, :] = (
                shifted(h1, s).astype(jnp.bfloat16))
        st2_ref[9 * cmid_p:9 * cmid_p + cin_p, :] = cat_ref[...]
        acc2 = jnp.dot(w23_ref[...], st2_ref[...],
                       preferred_element_type=jnp.float32)          # (Cout_p, Lpg)
        z = jnp.maximum(acc2 + p2[:, 0:1], 0.0)                     # + (b2+b3), ReLU

        # ---- BatchNorm2
        mean2 = jnp.sum(z * mask, axis=1, keepdims=True) * inv_cnt
        var2 = jnp.sum(jnp.square(z - mean2) * mask, axis=1, keepdims=True) * inv_cnt
        o_ref[...] = (z - mean2) * jax.lax.rsqrt(var2 + EPS) * p2[:, 1:2] + p2[:, 2:3]

    return kernel


# ----------------------------------- wrapper -----------------------------------
@partial(jax.jit, static_argnums=(3,))
def _forward_jit(d, e, p, roll_fwd):
    n, cd, h, w = d.shape
    _, ce, ho, wo = e.shape
    assert (ho, wo) == (2 * h, 2 * w)
    cin = cd + ce
    cmid = p["w1"].shape[0]
    cout = p["w2"].shape[0]

    SUB = 16                                  # bf16 native sublane tile
    cin_p = -(-cin // SUB) * SUB
    cmid_p = -(-cmid // SUB) * SUB
    cout_p = -(-cout // SUB) * SUB

    hp, wp = ho + 2, wo + 2                   # +1 zero-padding ring for the 3x3 convs
    lp = n * hp * wp                          # padded, flattened pixel axis
    gl = wp + 1                               # guard >= max |3x3 tap shift|
    lpg = -(-(lp + 2 * gl) // 128) * 128      # total lane count, multiple of 128
    gr = lpg - lp - gl                        # right guard (>= gl by construction)

    # ---- separable bilinear x2 upsample (align_corners=True): A @ img @ B^T with
    #      compile-time-constant A, B (replaces the dense kron scatter GEMM of v2).
    a = jnp.asarray(_interp_matrix_np(h, ho))          # (Ho, H)
    b = jnp.asarray(_interp_matrix_np(w, wo))          # (Wo, W)
    d_up = jnp.einsum("oh,nchw,pw->ncop", a, d, b)     # (N, Cd, Ho, Wo)

    # ---- one lane-dense, zero-ring-padded, guarded bf16 `cat` operand
    cat = jnp.transpose(jnp.concatenate([e, d_up], axis=1), (1, 0, 2, 3))
    cat = jnp.pad(cat, ((0, cin_p - cin), (0, 0), (1, 1), (1, 1)))
    cat = jnp.pad(cat.reshape(cin_p, lp), ((0, 0), (gl, gr))).astype(jnp.bfloat16)

    # validity mask: 1.0 exactly on the N*Ho*Wo real output pixels
    mask = jnp.pad(jnp.ones((n, ho, wo), jnp.float32), ((0, 0), (1, 1), (1, 1)))
    mask = jnp.pad(mask.reshape(1, lp), ((0, 0), (gl, gr)))

    # ---- pre-packed tap-stacked weights (one K-stacked contraction per conv)
    def pack_taps(wgt, ci, ci_p):             # (Co, Ci, 3, 3) -> (Co, 9*Ci_p)
        co = wgt.shape[0]
        t = jnp.transpose(wgt, (2, 3, 0, 1)).reshape(9, co, ci)
        t = jnp.pad(t, ((0, 0), (0, 0), (0, ci_p - ci)))
        return jnp.transpose(t, (1, 0, 2)).reshape(co, 9 * ci_p)

    w1p = jnp.pad(pack_taps(p["w1"], cin, cin_p),
                  ((0, cmid_p - cmid), (0, 0))).astype(jnp.bfloat16)
    w2p = pack_taps(p["w2"], cmid, cmid_p)
    w3p = jnp.pad(p["w3"].reshape(cout, cin), ((0, 0), (0, cin_p - cin)))
    w23p = jnp.pad(jnp.concatenate([w2p, w3p], axis=1),
                   ((0, cout_p - cout), (0, 0))).astype(jnp.bfloat16)

    def pack_scalars(cols, cp):
        s = jnp.stack(cols, axis=1)
        return jnp.pad(s, ((0, cp - s.shape[0]), (0, 4 - s.shape[1])))

    p1c = pack_scalars([p["b1"], p["g1"], p["beta1"]], cmid_p)
    p2c = pack_scalars([p["b2"] + p["b3"], p["g2"], p["beta2"]], cout_p)

    # explicit VMEM budget for the single-shot resident design (review item):
    # operands + the two im2col scratches + a few f32 (C, Lpg) temporaries.
    bytes_est = lpg * (2 * cin_p * 2 + 9 * cin_p * 2 + (9 * cmid_p + cin_p) * 2
                       + 4 * 4 * cmid_p + 4 * 4 * cout_p) + (2 << 20)
    vmem_limit = int(min(max(2 * bytes_est, 32 << 20), 64 << 20))

    vmem = pl.BlockSpec(memory_space=pltpu.MemorySpace.VMEM)
    out_g = pl.pallas_call(
        _make_fused_kernel(wp, n * ho * wo, roll_fwd),
        out_shape=jax.ShapeDtypeStruct((cout_p, lpg), jnp.float32),
        in_specs=[vmem] * 6,
        out_specs=vmem,
        scratch_shapes=[pltpu.VMEM((9 * cin_p, lpg), jnp.bfloat16),
                        pltpu.VMEM((9 * cmid_p + cin_p, lpg), jnp.bfloat16)],
        compiler_params=pltpu.CompilerParams(vmem_limit_bytes=vmem_limit),
    )(cat, mask, w1p, w23p, p1c, p2c)

    # back to NCHW: drop channel padding / guards / ring
    out = out_g[:cout, gl:gl + lp].reshape(cout, n, hp, wp)[:, :, 1:1 + ho, 1:1 + wo]
    return jnp.transpose(out, (1, 0, 2, 3))


def expansive_block_forward(d, e, p):
    """d: (N, Cd, H, W), e: (N, Ce, 2H, 2W) float32 -> (N, Cout, 2H, 2W) float32."""
    return _forward_jit(d, e, p, _roll_is_forward())


# ------------------------------ pure-JAX reference ------------------------------
def _ref_forward(d, e, p):
    n, cd, h, w = d.shape
    ho, wo = 2 * h, 2 * w
    a = jnp.asarray(_interp_matrix_np(h, ho))
    b = jnp.asarray(_interp_matrix_np(w, wo))
    d_up = jnp.einsum("oh,nchw,pw->ncop", a, d, b)
    cat = jnp.concatenate([e, d_up], axis=1)

    def conv(x, wgt, bias, pad):
        y = jax.lax.conv_general_dilated(
            x, wgt, (1, 1), [(pad, pad), (pad, pad)],
            dimension_numbers=("NCHW", "OIHW", "NCHW"))
        return y + bias[None, :, None, None]

    def bn(x, g, bt):
        mean = jnp.mean(x, axis=(0, 2, 3), keepdims=True)
        var = jnp.mean((x - mean) ** 2, axis=(0, 2, 3), keepdims=True)
        return (x - mean) * jax.lax.rsqrt(var + EPS) * g[None, :, None, None] \
            + bt[None, :, None, None]

    y = jnp.maximum(conv(cat, p["w1"], p["b1"], 1), 0.0)
    y = bn(y, p["g1"], p["beta1"])
    o1 = conv(y, p["w2"], p["b2"], 1)
    o2 = conv(cat, p["w3"], p["b3"], 0)
    out = jnp.maximum(o1 + o2, 0.0)
    return bn(out, p["g2"], p["beta2"])


# ------------------------------------- main -------------------------------------
if __name__ == "__main__":
    key = jax.random.PRNGKey(0)
    ks = jax.random.split(key, 12)

    N, Cd, H, W = 2, 4, 8, 8        # d: low-res decoder feature
    Ce = 4                          # e: skip connection at 2x resolution
    Cin, Cmid, Cout = Cd + Ce, 8, 8

    d = jax.random.normal(ks[0], (N, Cd, H, W), jnp.float32)
    e = jax.random.normal(ks[1], (N, Ce, 2 * H, 2 * W), jnp.float32)

    params = dict(
        w1=0.2 * jax.random.normal(ks[2], (Cmid, Cin, 3, 3), jnp.float32),
        b1=0.1 * jax.random.normal(ks[3], (Cmid,), jnp.float32),
        g1=1.0 + 0.1 * jax.random.normal(ks[4], (Cmid,), jnp.float32),
        beta1=0.1 * jax.random.normal(ks[5], (Cmid,), jnp.float32),
        w2=0.2 * jax.random.normal(ks[6], (Cout, Cmid, 3, 3), jnp.float32),
        b2=0.1 * jax.random.normal(ks[7], (Cout,), jnp.float32),
        w3=0.2 * jax.random.normal(ks[8], (Cout, Cin, 1, 1), jnp.float32),
        b3=0.1 * jax.random.normal(ks[9], (Cout,), jnp.float32),
        g2=1.0 + 0.1 * jax.random.normal(ks[10], (Cout,), jnp.float32),
        beta2=0.1 * jax.random.normal(ks[11], (Cout,), jnp.float32),
    )

    out = jax.block_until_ready(expansive_block_forward(d, e, params))
    ref = jax.block_until_ready(_ref_forward(d, e, params))

    assert out.shape == (N, Cout, 2 * H, 2 * W), out.shape
    assert bool(jnp.all(jnp.isfinite(out)))
    # bf16 MXU operands for two chained convs + two BatchNorm rescales: tolerance
    # is set accordingly (f32 reference); typical max error observed is well below.
    max_err = float(jnp.max(jnp.abs(out - ref)))
    assert max_err < 5e-2, f"max abs error vs reference: {max_err}"
    print("KERNEL_OK")
</pallas_src>

<mosaic_0001>
module attributes {stable_mosaic.version = 11 : i64} {
  func.func @probe(%arg0: memref<8x128xf32, #tpu.memory_space<vmem>>, %arg1: memref<8x128xf32, #tpu.memory_space<vmem>>) attributes {dimension_semantics = [], scalar_prefetch = 0 : i64, scratch_operands = 0 : i64, tpu.core_type = #tpu.core_type<tc>} {
    %c0 = arith.constant 0 : index
    %c0_0 = arith.constant 0 : index
    %0 = vector.load %arg0[%c0, %c0_0] : memref<8x128xf32, #tpu.memory_space<vmem>>, vector<8x128xf32>
    %c1_i32 = arith.constant 1 : i32
    %1 = tpu.dynamic_rotate %0 by %c1_i32 dim 1 : vector<8x128xf32>, i32 -> vector<8x128xf32>
    %c0_1 = arith.constant 0 : index
    %c0_2 = arith.constant 0 : index
    %2 = vector.load %arg1[%c0_1, %c0_2] : memref<8x128xf32, #tpu.memory_space<vmem>>, vector<8x128xf32>
    tpu.vector_store %arg1[%c0_1, %c0_2], %1 {strides = array<i32>} : memref<8x128xf32, #tpu.memory_space<vmem>>, vector<8x128xf32>,
    return
  }
}

</mosaic_0001>

<bundles_post_ra>
// kernel: tpu_custom_call.1
= control target key start
LH: loop header
LB: loop body
LE: loop exit
PB: predicated region body
PF: predicated region fallthrough
CT: control target
= control target key end

     0   :  { %6 = vsyncpa [#allocation3], 0  ;;  %s106_s0 = inlined_call_operand.hbm [shape: f32[8,128], index: 0, kind: input, shape index: {}]   ;;  %s107_s1 = inlined_call_operand.hbm [shape: f32[8,128], index: 1, kind: output, shape index: {}]  }
   0x1   :  { %7 = vsyncpa [#allocation4], 0  ;;  %s87_s6 = smov [#allocation2]  }
   0x2   :  { %s14_s7 = sshll.u32 %s87_s6, 4  ;;  %s15_s7 = int_to_ptr.vmem [resolvable:$true] %s14_s7 }
   0x3   :  { %s51_s8 = scalar_lea.vmem %s15_s7, 128  ;;  %p56_p1 = scmp.lt.s32.totalorder %s15_s7, %s15_s7 }
   0x4   :  { %p52_p0 = scmp.ne.s32.totalorder %s15_s7, %s51_s8  ;;  %p57_p2 = scmp.lt.s32.totalorder %s51_s8, %s51_s8 }
   0x6   :  { %p58_p3 = por %p57_p2, %p56_p1 }
   0x8   :  { %p59_p4 = pnand %p58_p3, %p52_p0 }
   0xa   :  { %62 = shalt.err (!%p59_p4)
}
   0xb   :  { %17 = dma.hbm_to_vmem [thread:$0]  %s106_s0, 128, %s15_s7, [#allocation3]  }
   0xc   :  { %83 = dma.done.wait [#allocation3], 128  }
   0xd   :  { %84 = vsyncadd [#allocation3], 4294967168  ;;  %v21_v0 = vld [vmem:[#allocation2] sm:$0xff]  ;;  %s88_s11 = smov 1   ;;  %s89_s12 = smov [#allocation5]  }
   0xe   :  { %22 = vrot.lane.b32.xlu0 %v21_v0, %s88_s11  ;;  %s31_s13 = sshll.u32 %s89_s12, 4  ;;  %s32_s13 = int_to_ptr.vmem [resolvable:$true] %s31_s13 }
   0xf   :  { %s63_s14 = scalar_lea.vmem %s32_s13, 128  ;;  %p68_p6 = scmp.lt.s32.totalorder %s32_s13, %s32_s13 }
  0x10   :  { %p64_p5 = scmp.ne.s32.totalorder %s32_s13, %s63_s14  ;;  %p69_p7 = scmp.lt.s32.totalorder %s63_s14, %s63_s14 }
  0x12   :  { %p70_p8 = por %p69_p7, %p68_p6 }
  0x14   :  { %p71_p9 = pnand %p70_p8, %p64_p5 }
  0x80   :  { %v23_v1 = vpop.permute.xlu0 %22 }
  0x81   :  { %24 = vst [vmem:[#allocation5] sm:$0xff] %v23_v1 }
  0x82   :  { %74 = shalt.err (!%p71_p9)
}
  0x83   :  { %34 = dma.vmem_to_hbm [thread:$0]  %s32_s13, 128, %s107_s1, [#allocation4]  }
  0x84   :  { %85 = dma.done.wait [#allocation4], 128  }
  0x85   :  { %86 = vsyncadd [#allocation4], 4294967168 }
  0x86   :  { %38 = vsyncpa [#allocation3], 1 }
  0x87   :  { %39 = vsyncpa [#allocation4], 1 }

</bundles_post_ra>
